<compile_context>
chip_gen: v6e
topology: v6e:2x2x1
jax: 0.10.0
libtpu: 0.0.40
codegen_flags: <defaults>
</compile_context>

<pallas_src>
import functools

import jax
import jax.numpy as jnp
from jax.experimental import pallas as pl
from jax.experimental.pallas import tpu as pltpu


def _round_up(x: int, m: int) -> int:
    return ((x + m - 1) // m) * m


# -----------------------------------------------------------------------------
# Kernel: fused 2-layer MLP (Linear -> ReLU -> Linear), VPU-only,
#         batch laid out as (rows x 128 lanes) dense blocks.
# -----------------------------------------------------------------------------
def mlp_v1_kernel(w1_ref, b1_ref, w2_ref, b2_ref, x_ref, o_ref, *, chunk):
    # w1_ref : SMEM (F, H)        first linear weight, stored as W1^T
    # b1_ref : SMEM (H,)          first bias
    # w2_ref : SMEM (H,)          second linear weight (single row of torch W2)
    # b2_ref : SMEM (1,)          second bias
    # x_ref  : VMEM (F, TR, 128)  input tile, batch on (sublane, lane)
    # o_ref  : VMEM (TR, 128)     output tile, batch on (sublane, lane)
    nfeat, tr, _ = x_ref.shape
    nhidden = w1_ref.shape[1]
    n_chunks = tr // chunk

    # Hoist the ~37 scalar weight reads out of the chunk loop (loop-invariant).
    w1s = [[w1_ref[f, j] for j in range(nhidden)] for f in range(nfeat)]
    b1s = [b1_ref[j] for j in range(nhidden)]
    w2s = [w2_ref[j] for j in range(nhidden)]
    b2s = b2_ref[0]

    @pl.loop(0, n_chunks)
    def _(c):
        r0 = pl.multiple_of(c * chunk, chunk)
        # One (chunk, 128) slab per feature, loaded once and reused H times.
        xs = [x_ref[f, pl.ds(r0, chunk), :] for f in range(nfeat)]

        # Hidden unit 0 seeds the output accumulator; b2 is folded in here.
        acc = xs[0] * w1s[0][0]
        for f in range(1, nfeat):
            acc = acc + xs[f] * w1s[f][0]
        h = jnp.maximum(acc + b1s[0], 0.0)
        y = h * w2s[0] + b2s

        for j in range(1, nhidden):                 # static unroll, H == 6
            acc = xs[0] * w1s[0][j]
            for f in range(1, nfeat):               # static unroll, F is tiny
                acc = acc + xs[f] * w1s[f][j]
            h = jnp.maximum(acc + b1s[j], 0.0)      # ReLU
            y = y + h * w2s[j]

        o_ref[pl.ds(r0, chunk), :] = y.astype(o_ref.dtype)


# -----------------------------------------------------------------------------
# Wrapper
# -----------------------------------------------------------------------------
@functools.partial(jax.jit, static_argnames=("block_rows",))
def network_v1_forward(x, w1, b1, w2, b2, *, block_rows=2048):
    """Evaluate the v1 model with a single fused Pallas kernel.

    x  : (N, F) float32
    w1 : (H, F) float32   (torch nn.Linear(F, H).weight)
    b1 : (H,)   float32
    w2 : (1, H) float32   (torch nn.Linear(H, 1).weight)
    b2 : (1,)   float32
    returns (N, 1) float32
    """
    n, f = x.shape
    h = w1.shape[0]
    assert w1.shape == (h, f) and b1.shape == (h,)
    assert w2.shape == (1, h) and b2.shape == (1,)
    assert block_rows % 32 == 0 and block_rows >= 32

    # ---- tile sizing (all static Python ints) -------------------------------
    rows = pl.cdiv(n, 128)                       # rows of 128 batch lanes
    # Aim for >= 4 grid steps when there is enough work, tile a multiple of 8
    # sublanes, capped at block_rows (~ (F+1)*block_rows*128*4 B per step).
    tr = max(8, min(block_rows, _round_up(pl.cdiv(rows, 4), 8)))
    if tr >= 32:
        tr = _round_up(tr, 32)
        chunk = 32                               # (32, 128) sub-chunks in-kernel
    else:
        chunk = tr                               # 8/16/24-row tiny-batch path
    rows_pad = pl.cdiv(rows, tr) * tr
    n_pad = rows_pad * 128

    # ---- layout plumbing (fused by XLA under jit) ---------------------------
    xt = jnp.transpose(x.astype(jnp.float32))            # (F, N)
    xt = jnp.pad(xt, ((0, 0), (0, n_pad - n)))           # (F, N_pad)
    x_blk = xt.reshape(f, rows_pad, 128)                 # free (row-major)

    w1_t = w1.T.astype(jnp.float32)                      # (F, H)
    b1_s = b1.astype(jnp.float32)                        # (H,)
    w2_s = w2.reshape(h).astype(jnp.float32)             # (H,)
    b2_s = b2.astype(jnp.float32)                        # (1,)

    smem = pl.BlockSpec(memory_space=pltpu.MemorySpace.SMEM)

    # Double-buffered VMEM footprint: 2 * (x tile + out tile) + margin.
    tile_bytes = (f + 1) * tr * 128 * 4
    vmem_bytes = max(4 * tile_bytes + (4 << 20), 16 << 20)

    y_blk = pl.pallas_call(
        functools.partial(mlp_v1_kernel, chunk=chunk),
        out_shape=jax.ShapeDtypeStruct((rows_pad, 128), jnp.float32),
        grid=(rows_pad // tr,),
        in_specs=[
            smem,                                         # W1^T scalars
            smem,                                         # b1 scalars
            smem,                                         # W2 scalars
            smem,                                         # b2 scalar
            pl.BlockSpec((f, tr, 128), lambda i: (0, i, 0)),   # x tile (dense)
        ],
        out_specs=pl.BlockSpec((tr, 128), lambda i: (i, 0)),    # dense output
        compiler_params=pltpu.CompilerParams(
            dimension_semantics=("parallel",),            # batch shards across TCs
            vmem_limit_bytes=int(vmem_bytes),
        ),
    )(w1_t, b1_s, w2_s, b2_s, x_blk)

    # Padded tail rows are computed on zeros and discarded here.
    return y_blk.reshape(n_pad)[:n].reshape(n, 1)


# -----------------------------------------------------------------------------
# Deterministic parameter init (mimics nn.Linear's uniform(-1/sqrt(fan_in), .))
# -----------------------------------------------------------------------------
def init_params(key, nfeatures, hidden=6):
    k1, k2, k3, k4 = jax.random.split(key, 4)
    bound1 = 1.0 / jnp.sqrt(jnp.float32(nfeatures))
    bound2 = 1.0 / jnp.sqrt(jnp.float32(hidden))
    w1 = jax.random.uniform(k1, (hidden, nfeatures), jnp.float32, -bound1, bound1)
    b1 = jax.random.uniform(k2, (hidden,), jnp.float32, -bound1, bound1)
    w2 = jax.random.uniform(k3, (1, hidden), jnp.float32, -bound2, bound2)
    b2 = jax.random.uniform(k4, (1,), jnp.float32, -bound2, bound2)
    return w1, b1, w2, b2


if __name__ == "__main__":
    key = jax.random.PRNGKey(0)
    kx, kx2, kp = jax.random.split(key, 3)

    nfeatures = 4
    hidden = 6

    w1, b1, w2, b2 = init_params(kp, nfeatures, hidden)

    ok = True
    # Two batch sizes: one tiny (single grid step, padding path) and one that
    # exercises multiple grid steps / chunks. Both are small by HBM standards.
    for kk, batch in ((kx, 300), (kx2, 4113)):
        x = jax.random.normal(kk, (batch, nfeatures), jnp.float32)

        y = network_v1_forward(x, w1, b1, w2, b2)
        y = jax.block_until_ready(y)

        # Pure-JAX reference of the PyTorch forward (Linear -> ReLU -> Linear).
        h_ref = jnp.maximum(x @ w1.T + b1, 0.0)
        y_ref = h_ref @ w2.T + b2

        ok = ok and (y.shape == (batch, 1))
        ok = ok and bool(jnp.allclose(y, y_ref, atol=1e-5, rtol=1e-5))

    assert ok
    print("KERNEL_OK")
</pallas_src>

<mosaic_0001>
module attributes {stable_mosaic.version = 11 : i64} {
  func.func @mlp_v1_kernel(%arg0: i32, %arg1: memref<4x6xf32, #tpu.memory_space<smem>>, %arg2: memref<6xf32, #tpu.memory_space<smem>>, %arg3: memref<6xf32, #tpu.memory_space<smem>>, %arg4: memref<1xf32, #tpu.memory_space<smem>>, %arg5: memref<4x8x128xf32, #tpu.memory_space<vmem>>, %arg6: memref<8x128xf32, #tpu.memory_space<vmem>>) attributes {dimension_semantics = [#tpu.dimension_semantics<parallel>], iteration_bounds = array<i64: 1>, scalar_prefetch = 0 : i64, scratch_operands = 0 : i64, tpu.core_type = #tpu.core_type<tc>, window_params = [{transform_indices = @transform_0, window_bounds = array<i64: 4, 6>}, {transform_indices = @transform_1, window_bounds = array<i64: 6>}, {transform_indices = @transform_2, window_bounds = array<i64: 6>}, {transform_indices = @transform_3, window_bounds = array<i64: 1>}, {transform_indices = @transform_4, window_bounds = array<i64: 4, 8, 128>}, {transform_indices = @transform_5, window_bounds = array<i64: 8, 128>}]} {
    %c0 = arith.constant 0 : index
    %c0_0 = arith.constant 0 : index
    %0 = memref.load %arg1[%c0, %c0_0] : memref<4x6xf32, #tpu.memory_space<smem>>
    %c0_1 = arith.constant 0 : index
    %c1 = arith.constant 1 : index
    %1 = memref.load %arg1[%c0_1, %c1] : memref<4x6xf32, #tpu.memory_space<smem>>
    %c0_2 = arith.constant 0 : index
    %c2 = arith.constant 2 : index
    %2 = memref.load %arg1[%c0_2, %c2] : memref<4x6xf32, #tpu.memory_space<smem>>
    %c0_3 = arith.constant 0 : index
    %c3 = arith.constant 3 : index
    %3 = memref.load %arg1[%c0_3, %c3] : memref<4x6xf32, #tpu.memory_space<smem>>
    %c0_4 = arith.constant 0 : index
    %c4 = arith.constant 4 : index
    %4 = memref.load %arg1[%c0_4, %c4] : memref<4x6xf32, #tpu.memory_space<smem>>
    %c0_5 = arith.constant 0 : index
    %c5 = arith.constant 5 : index
    %5 = memref.load %arg1[%c0_5, %c5] : memref<4x6xf32, #tpu.memory_space<smem>>
    %c1_6 = arith.constant 1 : index
    %c0_7 = arith.constant 0 : index
    %6 = memref.load %arg1[%c1_6, %c0_7] : memref<4x6xf32, #tpu.memory_space<smem>>
    %c1_8 = arith.constant 1 : index
    %c1_9 = arith.constant 1 : index
    %7 = memref.load %arg1[%c1_8, %c1_9] : memref<4x6xf32, #tpu.memory_space<smem>>
    %c1_10 = arith.constant 1 : index
    %c2_11 = arith.constant 2 : index
    %8 = memref.load %arg1[%c1_10, %c2_11] : memref<4x6xf32, #tpu.memory_space<smem>>
    %c1_12 = arith.constant 1 : index
    %c3_13 = arith.constant 3 : index
    %9 = memref.load %arg1[%c1_12, %c3_13] : memref<4x6xf32, #tpu.memory_space<smem>>
    %c1_14 = arith.constant 1 : index
    %c4_15 = arith.constant 4 : index
    %10 = memref.load %arg1[%c1_14, %c4_15] : memref<4x6xf32, #tpu.memory_space<smem>>
    %c1_16 = arith.constant 1 : index
    %c5_17 = arith.constant 5 : index
    %11 = memref.load %arg1[%c1_16, %c5_17] : memref<4x6xf32, #tpu.memory_space<smem>>
    %c2_18 = arith.constant 2 : index
    %c0_19 = arith.constant 0 : index
    %12 = memref.load %arg1[%c2_18, %c0_19] : memref<4x6xf32, #tpu.memory_space<smem>>
    %c2_20 = arith.constant 2 : index
    %c1_21 = arith.constant 1 : index
    %13 = memref.load %arg1[%c2_20, %c1_21] : memref<4x6xf32, #tpu.memory_space<smem>>
    %c2_22 = arith.constant 2 : index
    %c2_23 = arith.constant 2 : index
    %14 = memref.load %arg1[%c2_22, %c2_23] : memref<4x6xf32, #tpu.memory_space<smem>>
    %c2_24 = arith.constant 2 : index
    %c3_25 = arith.constant 3 : index
    %15 = memref.load %arg1[%c2_24, %c3_25] : memref<4x6xf32, #tpu.memory_space<smem>>
    %c2_26 = arith.constant 2 : index
    %c4_27 = arith.constant 4 : index
    %16 = memref.load %arg1[%c2_26, %c4_27] : memref<4x6xf32, #tpu.memory_space<smem>>
    %c2_28 = arith.constant 2 : index
    %c5_29 = arith.constant 5 : index
    %17 = memref.load %arg1[%c2_28, %c5_29] : memref<4x6xf32, #tpu.memory_space<smem>>
    %c3_30 = arith.constant 3 : index
    %c0_31 = arith.constant 0 : index
    %18 = memref.load %arg1[%c3_30, %c0_31] : memref<4x6xf32, #tpu.memory_space<smem>>
    %c3_32 = arith.constant 3 : index
    %c1_33 = arith.constant 1 : index
    %19 = memref.load %arg1[%c3_32, %c1_33] : memref<4x6xf32, #tpu.memory_space<smem>>
    %c3_34 = arith.constant 3 : index
    %c2_35 = arith.constant 2 : index
    %20 = memref.load %arg1[%c3_34, %c2_35] : memref<4x6xf32, #tpu.memory_space<smem>>
    %c3_36 = arith.constant 3 : index
    %c3_37 = arith.constant 3 : index
    %21 = memref.load %arg1[%c3_36, %c3_37] : memref<4x6xf32, #tpu.memory_space<smem>>
    %c3_38 = arith.constant 3 : index
    %c4_39 = arith.constant 4 : index
    %22 = memref.load %arg1[%c3_38, %c4_39] : memref<4x6xf32, #tpu.memory_space<smem>>
    %c3_40 = arith.constant 3 : index
    %c5_41 = arith.constant 5 : index
    %23 = memref.load %arg1[%c3_40, %c5_41] : memref<4x6xf32, #tpu.memory_space<smem>>
    %c0_42 = arith.constant 0 : index
    %24 = memref.load %arg2[%c0_42] : memref<6xf32, #tpu.memory_space<smem>>
    %c1_43 = arith.constant 1 : index
    %25 = memref.load %arg2[%c1_43] : memref<6xf32, #tpu.memory_space<smem>>
    %c2_44 = arith.constant 2 : index
    %26 = memref.load %arg2[%c2_44] : memref<6xf32, #tpu.memory_space<smem>>
    %c3_45 = arith.constant 3 : index
    %27 = memref.load %arg2[%c3_45] : memref<6xf32, #tpu.memory_space<smem>>
    %c4_46 = arith.constant 4 : index
    %28 = memref.load %arg2[%c4_46] : memref<6xf32, #tpu.memory_space<smem>>
    %c5_47 = arith.constant 5 : index
    %29 = memref.load %arg2[%c5_47] : memref<6xf32, #tpu.memory_space<smem>>
    %c0_48 = arith.constant 0 : index
    %30 = memref.load %arg3[%c0_48] : memref<6xf32, #tpu.memory_space<smem>>
    %c1_49 = arith.constant 1 : index
    %31 = memref.load %arg3[%c1_49] : memref<6xf32, #tpu.memory_space<smem>>
    %c2_50 = arith.constant 2 : index
    %32 = memref.load %arg3[%c2_50] : memref<6xf32, #tpu.memory_space<smem>>
    %c3_51 = arith.constant 3 : index
    %33 = memref.load %arg3[%c3_51] : memref<6xf32, #tpu.memory_space<smem>>
    %c4_52 = arith.constant 4 : index
    %34 = memref.load %arg3[%c4_52] : memref<6xf32, #tpu.memory_space<smem>>
    %c5_53 = arith.constant 5 : index
    %35 = memref.load %arg3[%c5_53] : memref<6xf32, #tpu.memory_space<smem>>
    %c0_54 = arith.constant 0 : index
    %36 = memref.load %arg4[%c0_54] : memref<1xf32, #tpu.memory_space<smem>>
    %c0_i32 = arith.constant 0 : i32
    %c1_i32 = arith.constant 1 : i32
    %37 = arith.muli %c0_i32, %c1_i32 : i32
    %c0_i32_55 = arith.constant 0 : i32
    %38 = arith.addi %c0_i32_55, %37 : i32
    %c8_i32 = arith.constant 8 : i32
    %39 = arith.muli %38, %c8_i32 : i32
    %40 = tpu.assume_multiple %39, 8 : i32
    %c0_56 = arith.constant 0 : index
    %41 = arith.index_cast %40 : i32 to index
    %c0_57 = arith.constant 0 : index
    %42 = vector.load %arg5[%c0_56, %41, %c0_57] : memref<4x8x128xf32, #tpu.memory_space<vmem>>, vector<1x8x128xf32>
    %43 = vector.shape_cast %42 : vector<1x8x128xf32> to vector<8x128xf32>
    %c1_58 = arith.constant 1 : index
    %44 = arith.index_cast %40 : i32 to index
    %c0_59 = arith.constant 0 : index
    %45 = vector.load %arg5[%c1_58, %44, %c0_59] : memref<4x8x128xf32, #tpu.memory_space<vmem>>, vector<1x8x128xf32>
    %46 = vector.shape_cast %45 : vector<1x8x128xf32> to vector<8x128xf32>
    %c2_60 = arith.constant 2 : index
    %47 = arith.index_cast %40 : i32 to index
    %c0_61 = arith.constant 0 : index
    %48 = vector.load %arg5[%c2_60, %47, %c0_61] : memref<4x8x128xf32, #tpu.memory_space<vmem>>, vector<1x8x128xf32>
    %49 = vector.shape_cast %48 : vector<1x8x128xf32> to vector<8x128xf32>
    %c3_62 = arith.constant 3 : index
    %50 = arith.index_cast %40 : i32 to index
    %c0_63 = arith.constant 0 : index
    %51 = vector.load %arg5[%c3_62, %50, %c0_63] : memref<4x8x128xf32, #tpu.memory_space<vmem>>, vector<1x8x128xf32>
    %52 = vector.shape_cast %51 : vector<1x8x128xf32> to vector<8x128xf32>
    %53 = vector.broadcast %0 : f32 to vector<8x128xf32>
    %54 = arith.mulf %43, %53 : vector<8x128xf32>
    %55 = vector.broadcast %6 : f32 to vector<8x128xf32>
    %56 = arith.mulf %46, %55 : vector<8x128xf32>
    %57 = arith.addf %54, %56 : vector<8x128xf32>
    %58 = vector.broadcast %12 : f32 to vector<8x128xf32>
    %59 = arith.mulf %49, %58 : vector<8x128xf32>
    %60 = arith.addf %57, %59 : vector<8x128xf32>
    %61 = vector.broadcast %18 : f32 to vector<8x128xf32>
    %62 = arith.mulf %52, %61 : vector<8x128xf32>
    %63 = arith.addf %60, %62 : vector<8x128xf32>
    %64 = vector.broadcast %24 : f32 to vector<8x128xf32>
    %65 = arith.addf %63, %64 : vector<8x128xf32>
    %cst = arith.constant 0.000000e+00 : f32
    %66 = vector.broadcast %cst : f32 to vector<8x128xf32>
    %67 = arith.maximumf %65, %66 : vector<8x128xf32>
    %68 = vector.broadcast %30 : f32 to vector<8x128xf32>
    %69 = arith.mulf %67, %68 : vector<8x128xf32>
    %70 = vector.broadcast %36 : f32 to vector<8x128xf32>
    %71 = arith.addf %69, %70 : vector<8x128xf32>
    %72 = vector.broadcast %1 : f32 to vector<8x128xf32>
    %73 = arith.mulf %43, %72 : vector<8x128xf32>
    %74 = vector.broadcast %7 : f32 to vector<8x128xf32>
    %75 = arith.mulf %46, %74 : vector<8x128xf32>
    %76 = arith.addf %73, %75 : vector<8x128xf32>
    %77 = vector.broadcast %13 : f32 to vector<8x128xf32>
    %78 = arith.mulf %49, %77 : vector<8x128xf32>
    %79 = arith.addf %76, %78 : vector<8x128xf32>
    %80 = vector.broadcast %19 : f32 to vector<8x128xf32>
    %81 = arith.mulf %52, %80 : vector<8x128xf32>
    %82 = arith.addf %79, %81 : vector<8x128xf32>
    %83 = vector.broadcast %25 : f32 to vector<8x128xf32>
    %84 = arith.addf %82, %83 : vector<8x128xf32>
    %cst_64 = arith.constant 0.000000e+00 : f32
    %85 = vector.broadcast %cst_64 : f32 to vector<8x128xf32>
    %86 = arith.maximumf %84, %85 : vector<8x128xf32>
    %87 = vector.broadcast %31 : f32 to vector<8x128xf32>
    %88 = arith.mulf %86, %87 : vector<8x128xf32>
    %89 = arith.addf %71, %88 : vector<8x128xf32>
    %90 = vector.broadcast %2 : f32 to vector<8x128xf32>
    %91 = arith.mulf %43, %90 : vector<8x128xf32>
    %92 = vector.broadcast %8 : f32 to vector<8x128xf32>
    %93 = arith.mulf %46, %92 : vector<8x128xf32>
    %94 = arith.addf %91, %93 : vector<8x128xf32>
    %95 = vector.broadcast %14 : f32 to vector<8x128xf32>
    %96 = arith.mulf %49, %95 : vector<8x128xf32>
    %97 = arith.addf %94, %96 : vector<8x128xf32>
    %98 = vector.broadcast %20 : f32 to vector<8x128xf32>
    %99 = arith.mulf %52, %98 : vector<8x128xf32>
    %100 = arith.addf %97, %99 : vector<8x128xf32>
    %101 = vector.broadcast %26 : f32 to vector<8x128xf32>
    %102 = arith.addf %100, %101 : vector<8x128xf32>
    %cst_65 = arith.constant 0.000000e+00 : f32
    %103 = vector.broadcast %cst_65 : f32 to vector<8x128xf32>
    %104 = arith.maximumf %102, %103 : vector<8x128xf32>
    %105 = vector.broadcast %32 : f32 to vector<8x128xf32>
    %106 = arith.mulf %104, %105 : vector<8x128xf32>
    %107 = arith.addf %89, %106 : vector<8x128xf32>
    %108 = vector.broadcast %3 : f32 to vector<8x128xf32>
    %109 = arith.mulf %43, %108 : vector<8x128xf32>
    %110 = vector.broadcast %9 : f32 to vector<8x128xf32>
    %111 = arith.mulf %46, %110 : vector<8x128xf32>
    %112 = arith.addf %109, %111 : vector<8x128xf32>
    %113 = vector.broadcast %15 : f32 to vector<8x128xf32>
    %114 = arith.mulf %49, %113 : vector<8x128xf32>
    %115 = arith.addf %112, %114 : vector<8x128xf32>
    %116 = vector.broadcast %21 : f32 to vector<8x128xf32>
    %117 = arith.mulf %52, %116 : vector<8x128xf32>
    %118 = arith.addf %115, %117 : vector<8x128xf32>
    %119 = vector.broadcast %27 : f32 to vector<8x128xf32>
    %120 = arith.addf %118, %119 : vector<8x128xf32>
    %cst_66 = arith.constant 0.000000e+00 : f32
    %121 = vector.broadcast %cst_66 : f32 to vector<8x128xf32>
    %122 = arith.maximumf %120, %121 : vector<8x128xf32>
    %123 = vector.broadcast %33 : f32 to vector<8x128xf32>
    %124 = arith.mulf %122, %123 : vector<8x128xf32>
    %125 = arith.addf %107, %124 : vector<8x128xf32>
    %126 = vector.broadcast %4 : f32 to vector<8x128xf32>
    %127 = arith.mulf %43, %126 : vector<8x128xf32>
    %128 = vector.broadcast %10 : f32 to vector<8x128xf32>
    %129 = arith.mulf %46, %128 : vector<8x128xf32>
    %130 = arith.addf %127, %129 : vector<8x128xf32>
    %131 = vector.broadcast %16 : f32 to vector<8x128xf32>
    %132 = arith.mulf %49, %131 : vector<8x128xf32>
    %133 = arith.addf %130, %132 : vector<8x128xf32>
    %134 = vector.broadcast %22 : f32 to vector<8x128xf32>
    %135 = arith.mulf %52, %134 : vector<8x128xf32>
    %136 = arith.addf %133, %135 : vector<8x128xf32>
    %137 = vector.broadcast %28 : f32 to vector<8x128xf32>
    %138 = arith.addf %136, %137 : vector<8x128xf32>
    %cst_67 = arith.constant 0.000000e+00 : f32
    %139 = vector.broadcast %cst_67 : f32 to vector<8x128xf32>
    %140 = arith.maximumf %138, %139 : vector<8x128xf32>
    %141 = vector.broadcast %34 : f32 to vector<8x128xf32>
    %142 = arith.mulf %140, %141 : vector<8x128xf32>
    %143 = arith.addf %125, %142 : vector<8x128xf32>
    %144 = vector.broadcast %5 : f32 to vector<8x128xf32>
    %145 = arith.mulf %43, %144 : vector<8x128xf32>
    %146 = vector.broadcast %11 : f32 to vector<8x128xf32>
    %147 = arith.mulf %46, %146 : vector<8x128xf32>
    %148 = arith.addf %145, %147 : vector<8x128xf32>
    %149 = vector.broadcast %17 : f32 to vector<8x128xf32>
    %150 = arith.mulf %49, %149 : vector<8x128xf32>
    %151 = arith.addf %148, %150 : vector<8x128xf32>
    %152 = vector.broadcast %23 : f32 to vector<8x128xf32>
    %153 = arith.mulf %52, %152 : vector<8x128xf32>
    %154 = arith.addf %151, %153 : vector<8x128xf32>
    %155 = vector.broadcast %29 : f32 to vector<8x128xf32>
    %156 = arith.addf %154, %155 : vector<8x128xf32>
    %cst_68 = arith.constant 0.000000e+00 : f32
    %157 = vector.broadcast %cst_68 : f32 to vector<8x128xf32>
    %158 = arith.maximumf %156, %157 : vector<8x128xf32>
    %159 = vector.broadcast %35 : f32 to vector<8x128xf32>
    %160 = arith.mulf %158, %159 : vector<8x128xf32>
    %161 = arith.addf %143, %160 : vector<8x128xf32>
    %162 = arith.index_cast %40 : i32 to index
    %c0_69 = arith.constant 0 : index
    %163 = vector.load %arg6[%162, %c0_69] : memref<8x128xf32, #tpu.memory_space<vmem>>, vector<8x128xf32>
    tpu.vector_store %arg6[%162, %c0_69], %161 {strides = array<i32>} : memref<8x128xf32, #tpu.memory_space<vmem>>, vector<8x128xf32>,
    %c1_i32_70 = arith.constant 1 : i32
    return
  }
  func.func @transform_0(%arg0: i32) -> (i32, i32) {
    %c0_i32 = arith.constant 0 : i32
    %c0_i32_0 = arith.constant 0 : i32
    %c0_i32_1 = arith.constant 0 : i32
    return %c0_i32, %c0_i32_0 : i32, i32
  }
  func.func @transform_1(%arg0: i32) -> i32 {
    %c0_i32 = arith.constant 0 : i32
    %c0_i32_0 = arith.constant 0 : i32
    return %c0_i32 : i32
  }
  func.func @transform_2(%arg0: i32) -> i32 {
    %c0_i32 = arith.constant 0 : i32
    %c0_i32_0 = arith.constant 0 : i32
    return %c0_i32 : i32
  }
  func.func @transform_3(%arg0: i32) -> i32 {
    %c0_i32 = arith.constant 0 : i32
    %c0_i32_0 = arith.constant 0 : i32
    return %c0_i32 : i32
  }
  func.func @transform_4(%arg0: i32) -> (i32, i32, i32) {
    %c0_i32 = arith.constant 0 : i32
    %c0_i32_0 = arith.constant 0 : i32
    %c0_i32_1 = arith.constant 0 : i32
    return %c0_i32, %arg0, %c0_i32_0 : i32, i32, i32
  }
  func.func @transform_5(%arg0: i32) -> (i32, i32) {
    %c0_i32 = arith.constant 0 : i32
    %c0_i32_0 = arith.constant 0 : i32
    return %arg0, %c0_i32 : i32, i32
  }
}

</mosaic_0001>

<bundles_post_ra>
// kernel: network_v1_forward.1
= control target key start
LH: loop header
LB: loop body
LE: loop exit
PB: predicated region body
PF: predicated region fallthrough
CT: control target
= control target key end

     0   :  { %11 = vsyncpa [#allocation4], 0  ;;  %s434_s0 = inlined_call_operand.vmem [shape: f32[4,6], index: 0, kind: input, shape index: {}]   ;;  %s435_s1 = inlined_call_operand.vmem [shape: f32[6], index: 1, kind: input, shape index: {}]   ;;  %s436_s2 = inlined_call_operand.vmem [shape: f32[6], index: 2, kind: input, shape index: {}]   ;;  %s437_s3 = inlined_call_operand.<no memory space> [shape: f32[1], index: 3, kind: input, shape index: {}]   ;;  %s438_s4 = inlined_call_operand.vmem [shape: f32[4,8,128], index: 4, kind: input, shape index: {}]   ;;  %s439_s5 = inlined_call_operand.vmem [shape: f32[8,128], index: 5, kind: output, shape index: {}]  }
   0x1   :  { %12 = vsyncpa [#allocation6], 0  ;;  %s29_s20 = sshll.u32 %s435_s1, 4  ;;  %s19_s23 = sshll.u32 %s434_s0, 4  ;;  %s30_s20 = int_to_ptr.vmem [resolvable:$true] %s29_s20  ;;  %s20_s23 = int_to_ptr.vmem [resolvable:$true] %s19_s23 }
   0x2   :  { %s256_s24 = scalar_lea.vmem %s30_s20, 16  ;;  %p261_p1 = scmp.lt.s32.totalorder %s30_s20, %s30_s20 }
   0x3   :  { %p257_p0 = scmp.ne.s32.totalorder %s30_s20, %s256_s24  ;;  %p262_p2 = scmp.lt.s32.totalorder %s256_s24, %s256_s24 }
   0x5   :  { %p263_p3 = por %p262_p2, %p261_p1 }
   0x7   :  { %p264_p4 = pnand %p263_p3, %p257_p0 }
   0x9   :  { %267 = shalt.err (!%p264_p4)
}
   0xa   :  { %s296_s25 = smov [#allocation5]   ;;  %s268_s26 = scalar_lea.vmem %s20_s23, 64 }
   0xb   :  { %32 = dma.vmem_to_smem %s30_s20, 16, %s296_s25, [#allocation6]  }
   0xc   :  { %p269_p5 = scmp.ne.s32.totalorder %s20_s23, %s268_s26  ;;  %p273_p6 = scmp.lt.s32.totalorder %s20_s23, %s20_s23 }
   0xd   :  { %p274_p7 = scmp.lt.s32.totalorder %s268_s26, %s268_s26 }
   0xf   :  { %p275_p8 = por %p274_p7, %p273_p6 }
  0x11   :  { %p276_p9 = pnand %p275_p8, %p269_p5 }
  0x13   :  { %279 = shalt.err (!%p276_p9)
}
  0x14   :  { %s297_s1 = smov [#allocation3]   ;;  %s39_s28 = sshll.u32 %s436_s2, 4  ;;  %s40_s28 = int_to_ptr.vmem [resolvable:$true] %s39_s28 }
  0x15   :  { %22 = dma.vmem_to_smem %s20_s23, 64, %s297_s1, [#allocation4]  }
  0x16   :  { %s280_s29 = scalar_lea.vmem %s40_s28, 16  ;;  %p285_p11 = scmp.lt.s32.totalorder %s40_s28, %s40_s28 }
  0x17   :  { %p281_p10 = scmp.ne.s32.totalorder %s40_s28, %s280_s29  ;;  %p286_p12 = scmp.lt.s32.totalorder %s280_s29, %s280_s29 }
  0x19   :  { %p287_p13 = por %p286_p12, %p285_p11 }
  0x1b   :  { %p288_p0 = pnand %p287_p13, %p281_p10 }
  0x1d   :  { %291 = shalt.err (!%p288_p0)
}
  0x1e   :  { %s298_s30 = smov [#allocation7]  }
  0x1f   :  { %42 = dma.vmem_to_smem %s40_s28, 16, %s298_s30, [#allocation6]  }
  0x20   :  { %292 = dma.done.wait [#allocation4], 64  }
  0x21   :  { %293 = vsyncadd [#allocation4], 4294967232 }
  0x22   :  { %294 = dma.done.wait [#allocation6], 32  }
  0x23   :  { %295 = vsyncadd [#allocation6], 4294967264 }
  0x24   :  { %56 = sfence }
  0x25   :  { %s57_s6 = sld [smem:[#allocation3]]  ;;  %v94_v0 = vld [vmem:[%s438_s4] sm:$0xff]  ;;  %v250_v2 = vld [vmem:[%s438_s4 + $0x8] sm:$0xff]  ;;  %v251_v14 = vld [vmem:[%s438_s4 + $0x10] sm:$0xff] }
  0x26   :  { %s338_s7 = sld [smem:[#allocation3 + $0x1]]  ;;  %v252_v37 = vld [vmem:[%s438_s4 + $0x18] sm:$0xff] }
  0x27   :  { %s340_s8 = sld [smem:[#allocation3 + $0x2]] }
  0x28   :  { %s342_s2 = sld [smem:[#allocation3 + $0x3]] }
  0x29   :  { %s344_s9 = sld [smem:[#allocation3 + $0x4]] }
  0x2a   :  { %s346_s10 = sld [smem:[#allocation3 + $0x5]] }
  0x2b   :  { %s222_s11 = sld [smem:[#allocation3 + $0x80]]  ;;  %v104_v1 = vstv %s57_s6 }
  0x2c   :  { %s223_s12 = sld [smem:[#allocation3 + $0x81]]  ;;  %v122_v4 = vstv %s338_s7  ;;  %v105_v6 = vmul.f32 %v104_v1, %v94_v0 }
  0x2d   :  { %s224_s13 = sld [smem:[#allocation3 + $0x82]]  ;;  %v139_v7 = vstv %s340_s8  ;;  %v123_v15 = vmul.f32 %v122_v4, %v94_v0 }
  0x2e   :  { %s348_s14 = sld [smem:[#allocation3 + $0x83]]  ;;  %v156_v9 = vstv %s342_s2  ;;  %v140_v18 = vmul.f32 %v139_v7, %v94_v0 }
  0x2f   :  { %s350_s15 = sld [smem:[#allocation3 + $0x84]]  ;;  %v173_v12 = vstv %s344_s9  ;;  %v157_v20 = vmul.f32 %v156_v9, %v94_v0 }
  0x30   :  { %s352_s16 = sld [smem:[#allocation3 + $0x85]]  ;;  %v190_v13 = vstv %s346_s10  ;;  %v174_v24 = vmul.f32 %v173_v12, %v94_v0 }
  0x31   :  { %s357_s19 = sld [smem:[#allocation3 + $0x100]]  ;;  %v106_v3 = vstv %s222_s11  ;;  %v191_v25 = vmul.f32 %v190_v13, %v94_v0 }
  0x32   :  { %s362_s22 = sld [smem:[#allocation3 + $0x101]]  ;;  %v124_v5 = vstv %s223_s12  ;;  %v107_v10 = vmul.f32 %v250_v2, %v106_v3 }
  0x33   :  { %s365_s23 = sld [smem:[#allocation3 + $0x102]]  ;;  %v141_v8 = vstv %s224_s13  ;;  %v125_v16 = vmul.f32 %v250_v2, %v124_v5 }
  0x34   :  { %s369_s24 = sld [smem:[#allocation3 + $0x103]]  ;;  %v158_v11 = vstv %s348_s14  ;;  %v142_v19 = vmul.f32 %v250_v2, %v141_v8  ;;  %v108_v26 = vadd.f32 %v107_v10, %v105_v6 }
  0x35   :  { %s374_s25 = sld [smem:[#allocation3 + $0x104]]  ;;  %v175_v17 = vstv %s350_s15  ;;  %v159_v23 = vmul.f32 %v250_v2, %v158_v11  ;;  %v126_v30 = vadd.f32 %v125_v16, %v123_v15 }
  0x36   :  { %s380_s0 = sld [smem:[#allocation3 + $0x105]]  ;;  %v192_v21 = vstv %s352_s16  ;;  %v176_v29 = vmul.f32 %v250_v2, %v175_v17  ;;  %v143_v34 = vadd.f32 %v142_v19, %v140_v18 }
  0x37   :  { %s383_s27 = sld [smem:[#allocation3 + $0x180]]  ;;  %v109_v22 = vstv %s357_s19  ;;  %v193_v33 = vmul.f32 %v250_v2, %v192_v21  ;;  %v160_v38 = vadd.f32 %v159_v23, %v157_v20  ;;  %v120_v21 = vstv %s437_s3 }
  0x38   :  { %s386_s28 = sld [smem:[#allocation3 + $0x181]]  ;;  %v110_v27 = vmul.f32 %v251_v14, %v109_v22  ;;  %v127_v28 = vstv %s362_s22  ;;  %v177_v42 = vadd.f32 %v176_v29, %v174_v24 }
  0x39   :  { %s389_s29 = sld [smem:[#allocation3 + $0x182]]  ;;  %v128_v31 = vmul.f32 %v251_v14, %v127_v28  ;;  %v144_v32 = vstv %s365_s23  ;;  %v194_v47 = vadd.f32 %v193_v33, %v191_v25 }
  0x3a   :  { %s392_s30 = sld [smem:[#allocation3 + $0x183]]  ;;  %v145_v35 = vmul.f32 %v251_v14, %v144_v32  ;;  %v161_v36 = vstv %s369_s24  ;;  %v111_v41 = vadd.f32 %v110_v27, %v108_v26 }
  0x3b   :  { %s395_s6 = sld [smem:[#allocation3 + $0x184]]  ;;  %v162_v39 = vmul.f32 %v251_v14, %v161_v36  ;;  %v178_v40 = vstv %s374_s25  ;;  %v129_v46 = vadd.f32 %v128_v31, %v126_v30 }
  0x3c   :  { %s401_s2 = sld [smem:[#allocation3 + $0x185]]  ;;  %v179_v43 = vmul.f32 %v251_v14, %v178_v40  ;;  %v195_v44 = vstv %s380_s0  ;;  %v146_v50 = vadd.f32 %v145_v35, %v143_v34 }
  0x3d   :  { %s404_s9 = sld [smem:[#allocation5]]  ;;  %v112_v45 = vstv %s383_s27  ;;  %v196_v51 = vmul.f32 %v251_v14, %v195_v44  ;;  %v163_v54 = vadd.f32 %v162_v39, %v160_v38 }
  0x3e   :  { %s407_s10 = sld [smem:[#allocation5 + $0x1]]  ;;  %v113_v48 = vmul.f32 %v252_v37, %v112_v45  ;;  %v130_v49 = vstv %s386_s28  ;;  %v180_v58 = vadd.f32 %v179_v43, %v177_v42 }
  0x3f   :  { %s410_s4 = sld [smem:[#allocation5 + $0x2]]  ;;  %v131_v52 = vmul.f32 %v252_v37, %v130_v49  ;;  %v147_v53 = vstv %s389_s29  ;;  %v197_v0 = vadd.f32 %v196_v51, %v194_v47 }
  0x40   :  { %s413_s11 = sld [smem:[#allocation5 + $0x3]]  ;;  %v114_v55 = vadd.f32 %v113_v48, %v111_v41  ;;  %v148_v56 = vmul.f32 %v252_v37, %v147_v53  ;;  %v164_v57 = vstv %s392_s30 }
  0x41   :  { %s416_s12 = sld [smem:[#allocation5 + $0x4]]  ;;  %v132_v59 = vadd.f32 %v131_v52, %v129_v46  ;;  %v165_v60 = vmul.f32 %v252_v37, %v164_v57  ;;  %v181_v61 = vstv %s395_s6 }
  0x42   :  { %s419_s13 = sld [smem:[#allocation5 + $0x5]]  ;;  %v149_v62 = vadd.f32 %v148_v56, %v146_v50  ;;  %v182_v63 = vmul.f32 %v252_v37, %v181_v61  ;;  %v198_v1 = vstv %s401_s2 }
  0x43   :  { %s87_s14 = sld [smem:[#allocation7]]  ;;  %v115_v2 = vstv %s404_s9  ;;  %v166_v3 = vadd.f32 %v165_v60, %v163_v54  ;;  %v199_v4 = vmul.f32 %v252_v37, %v198_v1 }
  0x44   :  { %s245_s15 = sld [smem:[#allocation7 + $0x1]]  ;;  %v116_v5 = vadd.f32 %v115_v2, %v114_v55  ;;  %v133_v6 = vstv %s407_s10  ;;  %v183_v7 = vadd.f32 %v182_v63, %v180_v58 }
  0x45   :  { %s246_s16 = sld [smem:[#allocation7 + $0x2]]  ;;  %v134_v8 = vadd.f32 %v133_v6, %v132_v59  ;;  %v150_v9 = vstv %s410_s4  ;;  %v200_v13 = vadd.f32 %v199_v4, %v197_v0 }
  0x46   :  { %s247_s17 = sld [smem:[#allocation7 + $0x3]]  ;;  %v117_v10 = vmax.f32 %v116_v5, 0.0  ;;  %v151_v11 = vadd.f32 %v150_v9, %v149_v62  ;;  %v167_v12 = vstv %s413_s11 }
  0x47   :  { %s248_s18 = sld [smem:[#allocation7 + $0x4]]  ;;  %v135_v14 = vmax.f32 %v134_v8, 0.0  ;;  %v168_v15 = vadd.f32 %v167_v12, %v166_v3  ;;  %v184_v16 = vstv %s416_s12 }
  0x48   :  { %s249_s19 = sld [smem:[#allocation7 + $0x5]]  ;;  %v152_v17 = vmax.f32 %v151_v11, 0.0  ;;  %v185_v18 = vadd.f32 %v184_v16, %v183_v7  ;;  %v201_v19 = vstv %s419_s13 }
  0x49   :  { %v118_v20 = vstv %s87_s14  ;;  %v169_v24 = vmax.f32 %v168_v15, 0.0  ;;  %v202_v25 = vadd.f32 %v201_v19, %v200_v13 }
  0x4a   :  { %v119_v22 = vmul.f32 %v118_v20, %v117_v10  ;;  %v136_v23 = vstv %s245_s15  ;;  %v186_v31 = vmax.f32 %v185_v18, 0.0 }
  0x4b   :  { %v137_v26 = vmul.f32 %v136_v23, %v135_v14  ;;  %v153_v27 = vstv %s246_s16  ;;  %v203_v35 = vmax.f32 %v202_v25, 0.0 }
  0x4c   :  { %v121_v28 = vadd.f32 %v120_v21, %v119_v22  ;;  %v154_v29 = vmul.f32 %v153_v27, %v152_v17  ;;  %v170_v30 = vstv %s247_s17 }
  0x4d   :  { %v187_v32 = vstv %s248_s18  ;;  %v171_v34 = vmul.f32 %v170_v30, %v169_v24 }
  0x4e   :  { %v138_v33 = vadd.f32 %v137_v26, %v121_v28  ;;  %v204_v36 = vstv %s249_s19  ;;  %v188_v38 = vmul.f32 %v187_v32, %v186_v31 }
  0x4f   :  { %v205_v40 = vmul.f32 %v204_v36, %v203_v35 }
  0x50   :  { %v155_v37 = vadd.f32 %v154_v29, %v138_v33 }
  0x52   :  { %v172_v39 = vadd.f32 %v171_v34, %v155_v37 }
  0x54   :  { %v189_v41 = vadd.f32 %v188_v38, %v172_v39 }
  0x56   :  { %v206_v42 = vadd.f32 %v205_v40, %v189_v41 }
  0x58   :  { %207 = vst [vmem:[%s439_s5] sm:$0xff] %v206_v42 }
  0x59   :  { %212 = vsyncpa [#allocation4], 1 }
  0x5a   :  { %213 = vsyncpa [#allocation6], 1 }

</bundles_post_ra>
